<compile_context>
chip_gen: v5e
topology: v5e:2x2
jax: 0.10.0
libtpu: 0.0.40
codegen_flags: <defaults>
</compile_context>

<pallas_src>
import jax
import jax.numpy as jnp
from jax.experimental import pallas as pl
from jax.experimental.pallas import tpu as pltpu


def _rgbrgbdiff_kernel(cur_ref, out_ref, prev_ref):
    # cur_ref : (block_s, L)     current-frame tile (lane-dense)
    # out_ref : (2, block_s, L)  slot 0 -> cur, slot 1 -> cur - prev
    # prev_ref: (block_s, L)     VMEM carry of the previous frame's tile
    t = pl.program_id(2)
    cur = cur_ref[...]

    @pl.when(t > 0)
    def _():
        out_ref[0] = cur
        out_ref[1] = cur - prev_ref[...]

    # Carry the current frame tile for the next temporal step.
    prev_ref[...] = cur


def _choose_lane_layout(f: int) -> tuple[int, int]:
    """Factor f == s * lane with lane a multiple of 128 (lane-dense) if possible."""
    if f % 128 == 0:
        # Prefer the widest lane dim that still leaves >= 8 sublanes.
        for lane in (2048, 1024, 512, 256, 128):
            if f % lane == 0 and f // lane >= 8:
                return f // lane, lane
        return f // 128, 128
    # Fallback: single row, full-extent trailing dims (full-dim exemption).
    return 1, f


def _choose_block_s(s: int, lane: int, itemsize: int,
                    target_bytes: int = 1 << 20) -> int:
    """Largest sublane block (multiple of 8 dividing s, or s itself) within budget."""
    if s * lane * itemsize <= target_bytes:
        return s
    max_bs = max(8, target_bytes // (lane * itemsize))
    bs = (max_bs // 8) * 8
    while bs >= 8:
        if s % bs == 0:
            return bs
        bs -= 8
    return s


def rgbrgbdiff(image: jax.Array) -> jax.Array:
    """image: (N, T, C, H, W) -> (N, T-1, 2*C, H, W)."""
    n, t, c, h, w = image.shape
    assert t >= 2, "need at least two frames along the temporal axis"

    f = c * h * w
    s, lane = _choose_lane_layout(f)
    block_s = _choose_block_s(s, lane, image.dtype.itemsize)
    s_blocks = s // block_s

    # Free, contiguous reshape to the lane-dense view.
    x = image.reshape(n, t, s, lane)

    grid = (n, s_blocks, t)  # T innermost / "arbitrary" so the VMEM carry is valid.

    in_spec = pl.BlockSpec(
        (pl.Squeezed(), pl.Squeezed(), block_s, lane),
        lambda ni, si, ti: (ni, ti, si, 0),
    )
    # Output block for t=0 and t=1 is the same (temporal 0); t=0 writes nothing,
    # t=1 fills it, so the resident block is complete before writeback.
    out_spec = pl.BlockSpec(
        (pl.Squeezed(), pl.Squeezed(), 2, block_s, lane),
        lambda ni, si, ti: (ni, jnp.maximum(ti - 1, 0), 0, si, 0),
    )

    out = pl.pallas_call(
        _rgbrgbdiff_kernel,
        out_shape=jax.ShapeDtypeStruct((n, t - 1, 2, s, lane), image.dtype),
        grid=grid,
        in_specs=[in_spec],
        out_specs=out_spec,
        scratch_shapes=[pltpu.VMEM((block_s, lane), image.dtype)],
        compiler_params=pltpu.CompilerParams(
            dimension_semantics=("parallel", "parallel", "arbitrary")
        ),
    )(x)

    # (N, T-1, 2, S, L) -> (N, T-1, 2*C, H, W); channels [0:C]=cur, [C:2C]=diff.
    return out.reshape(n, t - 1, 2 * c, h, w)


def rgbrgbdiff_reference(image: jax.Array) -> jax.Array:
    """Pure-JAX reference matching the PyTorch module exactly."""
    cur = image[:, 1:, ...]
    prev = image[:, :-1, ...]
    return jnp.concatenate([cur, cur - prev], axis=2)


if __name__ == "__main__":
    key = jax.random.PRNGKey(0)
    # (N, T, C, H, W)
    image = jax.random.normal(key, (2, 8, 4, 16, 16), dtype=jnp.float32)

    out = rgbrgbdiff(image)
    out = jax.block_until_ready(out)

    ref = rgbrgbdiff_reference(image)
    assert out.shape == (2, 7, 8, 16, 16), out.shape
    assert jnp.allclose(out, ref, atol=1e-6, rtol=1e-6), "mismatch vs reference"

    print("KERNEL_OK")
</pallas_src>

<mosaic_0001>
module attributes {stable_mosaic.version = 11 : i64} {
  func.func @_rgbrgbdiff_kernel(%arg0: i32, %arg1: i32, %arg2: i32, %arg3: memref<1x1x8x128xf32, #tpu.memory_space<vmem>>, %arg4: memref<1x1x2x8x128xf32, #tpu.memory_space<vmem>>, %arg5: memref<8x128xf32, #tpu.memory_space<vmem>>) attributes {dimension_semantics = [#tpu.dimension_semantics<parallel>, #tpu.dimension_semantics<parallel>, #tpu.dimension_semantics<arbitrary>], iteration_bounds = array<i64: 2, 1, 8>, scalar_prefetch = 0 : i64, scratch_operands = 1 : i64, tpu.core_type = #tpu.core_type<tc>, window_params = [{transform_indices = @transform_0, window_bounds = array<i64: 1, 1, 8, 128>}, {transform_indices = @transform_1, window_bounds = array<i64: 1, 1, 2, 8, 128>}]} {
    %c0 = arith.constant 0 : index
    %c0_0 = arith.constant 0 : index
    %c0_1 = arith.constant 0 : index
    %c0_2 = arith.constant 0 : index
    %0 = vector.load %arg3[%c0, %c0_0, %c0_1, %c0_2] : memref<1x1x8x128xf32, #tpu.memory_space<vmem>>, vector<1x1x8x128xf32>
    %1 = vector.shape_cast %0 : vector<1x1x8x128xf32> to vector<8x128xf32>
    %c0_i32 = arith.constant 0 : i32
    %2 = arith.cmpi sgt, %arg2, %c0_i32 : i32
    %3 = arith.extui %2 : i1 to i32
    %c0_i32_3 = arith.constant 0 : i32
    %4 = arith.cmpi ne, %3, %c0_i32_3 : i32
    scf.if %4 {
      %c0_6 = arith.constant 0 : index
      %c0_7 = arith.constant 0 : index
      %c0_8 = arith.constant 0 : index
      %c0_9 = arith.constant 0 : index
      %c0_10 = arith.constant 0 : index
      %6 = vector.load %arg4[%c0_6, %c0_7, %c0_8, %c0_9, %c0_10] : memref<1x1x2x8x128xf32, #tpu.memory_space<vmem>>, vector<1x1x1x8x128xf32>
      %7 = vector.shape_cast %6 : vector<1x1x1x8x128xf32> to vector<8x128xf32>
      %8 = vector.shape_cast %1 : vector<8x128xf32> to vector<1x1x1x8x128xf32>
      tpu.vector_store %arg4[%c0_6, %c0_7, %c0_8, %c0_9, %c0_10], %8 {strides = array<i32>} : memref<1x1x2x8x128xf32, #tpu.memory_space<vmem>>, vector<1x1x1x8x128xf32>,
      %c0_11 = arith.constant 0 : index
      %c0_12 = arith.constant 0 : index
      %9 = vector.load %arg5[%c0_11, %c0_12] : memref<8x128xf32, #tpu.memory_space<vmem>>, vector<8x128xf32>
      %10 = arith.subf %1, %9 : vector<8x128xf32>
      %c0_13 = arith.constant 0 : index
      %c0_14 = arith.constant 0 : index
      %c1 = arith.constant 1 : index
      %c0_15 = arith.constant 0 : index
      %c0_16 = arith.constant 0 : index
      %11 = vector.load %arg4[%c0_13, %c0_14, %c1, %c0_15, %c0_16] : memref<1x1x2x8x128xf32, #tpu.memory_space<vmem>>, vector<1x1x1x8x128xf32>
      %12 = vector.shape_cast %11 : vector<1x1x1x8x128xf32> to vector<8x128xf32>
      %13 = vector.shape_cast %10 : vector<8x128xf32> to vector<1x1x1x8x128xf32>
      tpu.vector_store %arg4[%c0_13, %c0_14, %c1, %c0_15, %c0_16], %13 {strides = array<i32>} : memref<1x1x2x8x128xf32, #tpu.memory_space<vmem>>, vector<1x1x1x8x128xf32>,
    } else {
    }
    %c0_4 = arith.constant 0 : index
    %c0_5 = arith.constant 0 : index
    %5 = vector.load %arg5[%c0_4, %c0_5] : memref<8x128xf32, #tpu.memory_space<vmem>>, vector<8x128xf32>
    tpu.vector_store %arg5[%c0_4, %c0_5], %1 {strides = array<i32>} : memref<8x128xf32, #tpu.memory_space<vmem>>, vector<8x128xf32>,
    return
  }
  func.func @transform_0(%arg0: i32, %arg1: i32, %arg2: i32) -> (i32, i32, i32, i32) {
    %c0_i32 = arith.constant 0 : i32
    %c0_i32_0 = arith.constant 0 : i32
    return %arg0, %arg2, %arg1, %c0_i32 : i32, i32, i32, i32
  }
  func.func @transform_1(%arg0: i32, %arg1: i32, %arg2: i32) -> (i32, i32, i32, i32, i32) {
    %c1_i32 = arith.constant 1 : i32
    %0 = arith.subi %arg2, %c1_i32 : i32
    %c0_i32 = arith.constant 0 : i32
    %1 = arith.maxsi %0, %c0_i32 : i32
    %c0_i32_0 = arith.constant 0 : i32
    %c0_i32_1 = arith.constant 0 : i32
    %c0_i32_2 = arith.constant 0 : i32
    return %arg0, %1, %c0_i32_0, %arg1, %c0_i32_1 : i32, i32, i32, i32, i32
  }
}

</mosaic_0001>

<bundles_post_ra>
// kernel: tpu_custom_call.1
= control target key start
LH: loop header
LB: loop body
LE: loop exit
PB: predicated region body
PF: predicated region fallthrough
CT: control target
= control target key end

     0   :  { %s767_s0 = inlined_call_operand.hbm [shape: f32[2,8,8,128], index: 0, kind: input, shape index: {}]   ;;  %s768_s1 = inlined_call_operand.hbm [shape: f32[2,7,2,8,128], index: 1, kind: output, shape index: {}]  }
   0x1   :  { %770 = sst [smem:[#allocation10_spill]] %s767_s0 }
   0x2   :  { %6 = vsyncpa [#allocation4], 0 }
   0x3   :  { %8 = vsyncpa [#allocation4 + $0x1], 0 }
   0x4   :  { %9 = vsyncpa [#allocation5], 0 }
   0x5   :  { %11 = vsyncpa [#allocation5 + $0x1], 0  ;;  %s591_s6 = smov 0   ;;  %s593_s7 = smov 0  }
   0x6   :  { %s595_s8 = smov 0   ;;  %s597_s9 = smov 0  }
   0x7   :  { %s599_s10 = smov 0   ;;  %s601_s11 = smov 0  }
   0x8   :  { %s603_s12 = smov 0   ;;  %s605_s13 = smov 0  }
   0x9   :  { %s607_s14 = smov 0   ;;  %s609_s15 = smov 0  }
   0xa   :  { %s611_s16 = smov 0  }
   0xb LB: > { %s300_s17 = sadd.s32 4294967295, %s577_s16   ;;  %s301_s18 = sadd.s32 4294967294, %s577_s16   ;;  %s577_s16 = sphi %s611_s16, %s17_s16   ;;  %s573_s15 = sphi %s609_s15, %s787_s15   ;;  %s569_s14 = sphi %s607_s14, %s786_s14   ;;  %s565_s13 = sphi %s605_s13, %s785_s13   ;;  %s561_s12 = sphi %s603_s12, %s784_s12   ;;  %s557_s11 = sphi %s601_s11, %s783_s11   ;;  %s553_s10 = sphi %s599_s10, %s782_s10   ;;  %s549_s9 = sphi %s597_s9, %s781_s9   ;;  %s545_s8 = sphi %s595_s8, %s780_s8   ;;  %s541_s7 = sphi %s593_s7, %s779_s7   ;;  %s537_s6 = sphi %s591_s6, %s778_s6  }
   0xc   : > { %s29_s19 = sadd.s32 1, %s569_s14  ;;  %s36_s20 = sadd.s32 1, %s573_s15 }
   0xd   : > { %p30_p0 = scmp.ge.s32.totalorder %s29_s19, 8  ;;  %s47_s21 = sadd.s32 1, %s557_s11 }
   0xe   : > { %p54_p1 = scmp.ne.s32.totalorder %s557_s11, %s553_s10  ;;  %p55_p2 = scmp.eq.s32.totalorder %s577_s16, 0 }
   0xf   : > { %s789_s19 = smov (%p30_p0, %s29_s19), 0  ;;  %s791_s20 = smov (!%p30_p0, %s36_s20), %s573_s15 }
  0x10   : > { %s41_s22 = ssub.s32 %s569_s14, %s789_s19  ;;  %p657_p3 = por %p55_p2, %p54_p1 }
  0x11   : > { %p38_p4 = scmp.ge.s32.totalorder %s791_s20, 2  ;;  %p60_p5 = scmp.ne.s32.totalorder %s553_s10, %s549_s9 }
  0x12   : > { %p61_p6 = scmp.eq.s32.totalorder %s300_s17, 0  ;;  %s302_s24 = sadd.s32 4294967295, %s569_s14 }
  0x13   : > { %s793_s20 = smov (%p38_p4, %s791_s20), 0  ;;  %p71_p8 = scmp.gt.s32.totalorder %s302_s24, 0 }
  0x14   : > { %772 = sst [smem:[#allocation9_spill]] %s793_s20  ;;  %p667_p7 = por %p61_p6, %p60_p5 }
  0x15   : > { %s40_s26 = ssub.s32 %s573_s15, %s793_s20  ;;  %s303_s27 = sadd.s32 4294967295, %s789_s19 }
  0x16   : > { %s42_s28 = sor.u32 %s41_s22, %s40_s26  ;;  %p74_p9 = scmp.gt.s32.totalorder %s303_s27, 0 }
  0x17   : > { %p45_p10 = scmp.eq.s32.totalorder %s42_s28, 0  ;;  %s83_s29 = sadd.s32 1, %s545_s8 }
  0x18   : > { %s795_s24 = smov (!%p71_p8, %s302_s24), 0  ;;  %s797_s27 = smov (!%p74_p9, %s303_s27), 0 }
  0x19   : > { %s676_s30 = scalar_select %p45_p10, %s557_s11, %s47_s21  }
  0x1a   : > { %p93_p11 = scmp.ne.s32.totalorder %s545_s8, %s541_s7  ;;  %p94_p12 = scmp.eq.s32.totalorder %s300_s17, 15 }
  0x1b   : > { %s77_s2 = ssub.s32 %s795_s24, %s797_s27  ;;  %p99_p13 = scmp.ne.s32.totalorder %s541_s7, %s537_s6 }
  0x1c   : > { %s78_s3 = sor.u32 %s77_s2, %s40_s26  ;;  %p684_p0 = por %p94_p12, %p93_p11 }
  0x1d   : > { %p81_p1 = scmp.eq.s32.totalorder %s78_s3, 0  ;;  %p100_p2 = scmp.eq.s32.totalorder %s301_s18, 15 }
  0x1e   : > { %p333_p4 = scmp.lt.s32.totalorder %s577_s16, 16  ;;  %s120_s17 = sand.u32 1, %s557_s11  }
  0x1f   : > { %s692_s5 = scalar_select %p81_p1, %s545_s8, %s83_s29  }
  0x20   : > { %p694_p5 = por %p100_p2, %p99_p13  ;;  %s306_s21 = sshll.u32 %s120_s17, 3 }
  0x21   : > { %s307_s22 = sshll.u32 %s573_s15, 3  ;;  %s124_s26 = scalar_lea.vmem [#allocation3], %s306_s21 }
  0x22   : > { %s129_s24 = sadd.s32 %s569_s14, %s307_s22  ;;  %s135_s27 = sshll.u32 %s124_s26, 4  ;;  %s136_s27 = int_to_ptr.vmem [resolvable:$true] %s135_s27 }
  0x23   : > { %s308_s28 = sshll.u32 %s129_s24, 3  ;;  %s776_s0 = sld [smem:[#allocation10_spill]] }
  0x24   : > { %p326_p6 = pnand %p333_p4, %p657_p3  ;;  %p309_p8 = scmp.ge.s32.totalorder %s577_s16, 1 }
  0x25   : > { %s121_s20 = scalar_lea.sflag [#allocation4], %s120_s17  ;;  %p140_p9 = scmp.lt.s32.totalorder %s577_s16, 17 }
  0x27   : > { %p141_p10 = pnand %p309_p8, %p140_p9 }
  0x28   : > { %s146_s21 = sand.u32 (!%p141_p10), 1, %s553_s10  }
  0x29   : > { %s131_s18 = scalar_lea.hbm %s776_s0, %s308_s28  ;;  %144 = sbr.rel (%p141_p10) target bundleno = 80 (0x50), region = 24 }
  0x2a   : > { %s133_s29 = sshll.u32 %s131_s18, 4  ;;  %s310_s22 = sshll.u32 (!%p141_p10), %s146_s21, 3  ;;  %s134_s29 = int_to_ptr.hbm [resolvable:$true] %s133_s29 }
  0x2b   : > { %328 = dma.hbm_to_vmem [thread:$0]  (!%p326_p6), %s134_s29, 128, %s136_s27, %s121_s20  }
  0x2c   : > { %s147_s24 = scalar_lea.sflag (!%p141_p10), [#allocation4], %s146_s21  ;;  %s150_s26 = scalar_lea.vmem (!%p141_p10), [#allocation3], %s310_s22 }
  0x2e   : > { %528 = dma.done.wait (%p667_p7), %s147_s24, 128  }
  0x2f   : > { %530 = vsyncadd (%p667_p7), %s147_s24, 4294967168  ;;  %s167_s23 = sand.u32 1, %s541_s7   ;;  %v173_v0 = vld [vmem:[%s150_s26] sm:$0xff]  ;;  %p312_p3 = scmp.le.s32.totalorder %s561_s12, 0 }
  0x30   : > { %s311_s28 = sshll.u32 %s167_s23, 4 }
  0x31   : > { %s169_s17 = scalar_lea.vmem [#allocation6], %s311_s28  ;;  %177 = sbr.rel (%p312_p3) target bundleno = 58 (0x3a), region = 32 }
  0x36   : > { %178 = vst [vmem:[%s169_s17] sm:$0xff] %v173_v0  ;;  %v179_v1 = vld [vmem:[#allocation2] sm:$0xff] }
  0x37   : > { %v180_v2 = vsub.f32 %v173_v0, %v179_v1 }
  0x39   : > { %313 = vst [vmem:[%s169_s17 + $0x8] sm:$0xff] %v180_v2 }
  0x3a PF: > { %183 = vst [vmem:[#allocation2] sm:$0xff] %v173_v0  ;;  %s315_s20 = sadd.s32 4294967295, %s561_s12  ;;  %s320_s25 = smul.u32 14, %s565_s13 }
  0x3b   : > { %p193_p11 = scmp.gt.s32.totalorder %s315_s20, 0  ;;  %s203_s27 = sshll.u32 %s169_s17, 4  ;;  %s204_s27 = int_to_ptr.vmem [resolvable:$true] %s203_s27 }
  0x3c   : > { %s185_s26 = scalar_lea.sflag [#allocation5], %s167_s23  ;;  %s475_s17 = scalar_lea.hbm %s768_s1, 224 }
  0x3d   : > { %s799_s20 = smov (!%p193_p11, %s315_s20), 0 }
  0x3e   : > { %s316_s2 = sshll.u32 %s799_s20, 1 }
  0x3f   : > { %s200_s3 = sadd.s32 %s320_s25, %s316_s2 }
  0x40   : > { %s317_s18 = sshll.u32 %s200_s3, 3 }
  0x41   : > { %s202_s22 = scalar_lea.hbm %s768_s1, %s317_s18 }
  0x42   : > { %s205_s24 = sshll.u32 %s202_s22, 4  ;;  %s206_s24 = int_to_ptr.hbm [resolvable:$true] %s205_s24 }
  0x43   : > { %s469_s28 = sshra.s32 %s206_s24, 4  ;;  %s470_s28 = int_to_ptr.hbm [resolvable:$true] %s469_s28 }
  0x44   : > { %s471_s0 = scalar_lea.hbm %s470_s28, 16  ;;  %p476_p1 = scmp.lt.s32.totalorder %s470_s28, %s768_s1 }
  0x45   : > { %p472_p7 = scmp.ne.s32.totalorder %s470_s28, %s471_s0  ;;  %p477_p2 = scmp.lt.s32.totalorder %s475_s17, %s471_s0 }
  0x47   : > { %p473_p12 = pnand %p472_p7, %p684_p0  ;;  %p478_p4 = por %p477_p2, %p476_p1 }
  0x49   : > { %p474_p13 = pneg %p473_p12 }
  0x4b   : > { %p479_p6 = pnand %p478_p4, %p474_p13 }
  0x4d   : > { %482 = shalt.err (!%p479_p6)
}
  0x4e   : > { %s579_s23 = smov 128   ;;  %s580_s2 = smov 8  }
  0x4f   : > { %323 = dma.vmem_to_hbm [thread:$0]  (%p684_p0), %s204_s27, 256, %s206_s24, %s185_s26, %s579_s23, %s579_s23, %s580_s2  }
  0x50 PF: > { %p334_p8 = scmp.ge.s32.totalorder %s577_s16, 2  ;;  %s220_s3 = sand.u32 1, %s537_s6  }
  0x51   : > { %s221_s18 = scalar_lea.sflag [#allocation5], %s220_s3 }
  0x52   : > { %p330_p9 = pnand %p334_p8, %p694_p5 }
  0x54   : > { %p331_p10 = pneg %p330_p9 }
  0x56   : > { %532 = dma.done.wait (%p331_p10), %s221_s18, 256  }
  0x57   : > { %534 = vsyncadd (%p331_p10), %s221_s18, 4294967040  ;;  %s17_s16 = sadd.s32 1, %s577_s16   ;;  %s777_s0 = sld [smem:[#allocation9_spill]] }
  0x58   : > { %p14_p3 = scmp.ge.s32.totalorder %s17_s16, 18   ;;  %s778_s6 = smov %s541_s7 }
  0x59   : > { %s779_s7 = smov %s545_s8  ;;  %s780_s8 = smov %s692_s5 }
  0x5a   : > { %s781_s9 = smov %s553_s10  ;;  %s782_s10 = smov %s557_s11 }
  0x5b   : > { %s783_s11 = smov %s676_s30  ;;  %s784_s12 = smov %s569_s14 }
  0x5c   : > { %s785_s13 = smov %s573_s15  ;;  %s786_s14 = smov %s789_s19 }
  0x5d   : > { %s787_s15 = smov %s777_s0  ;;  %16 = sbr.rel (!%p14_p3) target bundleno = 11 (0xb), region = 74 }
  0x62   :  { %227 = vsyncpa [#allocation4], 1 }
  0x63   :  { %229 = vsyncpa [#allocation4 + $0x1], 1 }
  0x64   :  { %230 = vsyncpa [#allocation5], 1 }
  0x65   :  { %232 = vsyncpa [#allocation5 + $0x1], 1 }

</bundles_post_ra>
